<compile_context>
chip_gen: v7x
topology: tpu7x:2x2x1
jax: 0.10.0
libtpu: 0.0.40
codegen_flags: <defaults>
</compile_context>

<pallas_src>
import math

import jax
import jax.numpy as jnp
import numpy as np
from jax import lax
from jax.experimental import pallas as pl
from jax.experimental.pallas import tpu as pltpu

# ---- config (small, consistent with the BertConfig fields used) ----
BATCH = 2
SEQ = 8
HIDDEN = 32
NUM_HEADS = 4
HEAD_DIM = HIDDEN // NUM_HEADS
LN_EPS = 1e-12


def bert_attention_kernel(x_ref, mask_ref, wqkv_ref, bqkv_ref, wo_ref, bo_ref,
                          gamma_ref, beta_ref, o_ref):
    """One batch element per grid step.

    x_ref:     (S, H)   hidden states for this batch element (f32)
    mask_ref:  (1, S)   additive attention mask (per key position)
    wqkv_ref:  (H, 3H)  fused QKV weights, columns per-head-contiguous [q_h|k_h|v_h]
    bqkv_ref:  (1, 3H)  fused QKV bias, same column layout
    wo_ref:    (H, H)   output dense weight (rows head-major, as in PyTorch)
    bo_ref:    (1, H)   output dense bias
    gamma/beta (1, H)   LayerNorm affine
    o_ref:     (S, H)   output
    """
    S, H = x_ref.shape
    nh, hd = NUM_HEADS, HEAD_DIM

    x = x_ref[...]                                                    # (S, H)

    # ---- fused, lane-dense QKV projection: one MXU pass, no x replication ----
    qkv = jnp.dot(x, wqkv_ref[...],
                  preferred_element_type=jnp.float32) + bqkv_ref[...]  # (S, 3H)

    # Per-head blocks via static minor-dim slices + leading-axis stack only
    # (no in-kernel transpose / tiled-dim reshape).
    heads = jnp.stack(
        [qkv[:, h * 3 * hd:(h + 1) * 3 * hd] for h in range(nh)],
        axis=0)                                                        # (nh, S, 3hd)
    q = heads[:, :, :hd]
    k = heads[:, :, hd:2 * hd]
    v = heads[:, :, 2 * hd:]

    # ---- head-batched attention (batch dim 0; contract head_dim; no k.T) ----
    scale = 1.0 / math.sqrt(hd)
    scores = lax.dot_general(
        q, k, dimension_numbers=(((2,), (2,)), ((0,), (0,))),
        preferred_element_type=jnp.float32) * scale                    # (nh, S, S)
    scores = scores + mask_ref[...][None]                              # (1,1,S) bcast
    scores = scores - jnp.max(scores, axis=-1, keepdims=True)
    p = jnp.exp(scores)
    denom = jnp.sum(p, axis=-1, keepdims=True)                         # >= 1
    p = p * pl.reciprocal(denom, approx=True)                          # EUP vrcp

    ctx = lax.dot_general(
        p, v, dimension_numbers=(((2,), (1,)), ((0,), (0,))),
        preferred_element_type=jnp.float32)                            # (nh, S, hd)

    # ---- output dense: lane-concat heads back to (S, H), contract K=H once ----
    ctx2 = jnp.concatenate([ctx[h] for h in range(nh)], axis=-1)       # (S, H)
    proj = jnp.dot(ctx2, wo_ref[...],
                   preferred_element_type=jnp.float32) + bo_ref[...]   # (S, H)

    # ---- residual + LayerNorm ----
    y = proj + x
    mu = jnp.mean(y, axis=-1, keepdims=True)
    var = jnp.mean((y - mu) ** 2, axis=-1, keepdims=True)
    y = (y - mu) * lax.rsqrt(var + LN_EPS)
    o_ref[...] = (gamma_ref[...] * y + beta_ref[...]).astype(o_ref.dtype)


def pack_params(params):
    """One-time (parameter-load time) packing. Pure layout plumbing."""
    H, nh, hd = HIDDEN, NUM_HEADS, HEAD_DIM
    wq = params["wq"].reshape(H, nh, hd)
    wk = params["wk"].reshape(H, nh, hd)
    wv = params["wv"].reshape(H, nh, hd)
    # Column order (head, {q,k,v}, head_dim) -> per-head-contiguous blocks.
    wqkv = jnp.stack([wq, wk, wv], axis=2).reshape(H, 3 * H)
    bq = params["bq"].reshape(1, nh, hd)
    bk = params["bk"].reshape(1, nh, hd)
    bv = params["bv"].reshape(1, nh, hd)
    bqkv = jnp.stack([bq, bk, bv], axis=2).reshape(1, 3 * H)
    return {
        "wqkv": wqkv, "bqkv": bqkv,
        "wo": params["wo"], "bo": params["bo"],
        "gamma": params["gamma"], "beta": params["beta"],
    }


@jax.jit
def bert_attention(x, mask, packed):
    """x: (B, S, H) f32; mask: (B, 1, 1, S) additive BERT mask."""
    B, S, H = x.shape
    mask2 = mask.reshape(B, 1, S).astype(x.dtype)

    const2 = lambda b: (0, 0)
    out = pl.pallas_call(
        bert_attention_kernel,
        out_shape=jax.ShapeDtypeStruct((B, S, H), x.dtype),
        grid=(B,),
        in_specs=[
            pl.BlockSpec((None, S, H), lambda b: (b, 0, 0)),    # x (streams)
            pl.BlockSpec((None, 1, S), lambda b: (b, 0, 0)),    # mask (streams)
            pl.BlockSpec((H, 3 * H), const2),                   # weights: resident
            pl.BlockSpec((1, 3 * H), const2),
            pl.BlockSpec((H, H), const2),
            pl.BlockSpec((1, H), const2),
            pl.BlockSpec((1, H), const2),
            pl.BlockSpec((1, H), const2),
        ],
        out_specs=pl.BlockSpec((None, S, H), lambda b: (b, 0, 0)),
        compiler_params=pltpu.CompilerParams(
            dimension_semantics=("parallel",)),
    )(x, mask2, packed["wqkv"], packed["bqkv"], packed["wo"], packed["bo"],
      packed["gamma"], packed["beta"])
    return out


def reference(x, mask, params):
    """Pure-JAX reference mirroring the PyTorch forward (eval mode)."""
    B, S, H = x.shape
    q = x @ params["wq"] + params["bq"]
    k = x @ params["wk"] + params["bk"]
    v = x @ params["wv"] + params["bv"]

    def split(t):  # (B,S,H) -> (B,nh,S,hd)
        return t.reshape(B, S, NUM_HEADS, HEAD_DIM).transpose(0, 2, 1, 3)

    qh, kh, vh = split(q), split(k), split(v)
    scores = jnp.einsum("bnqd,bnkd->bnqk", qh, kh) / math.sqrt(HEAD_DIM)
    scores = scores + mask                                    # broadcast (B,1,1,S)
    probs = jax.nn.softmax(scores, axis=-1)
    ctx = jnp.einsum("bnqk,bnkd->bnqd", probs, vh)
    ctx = ctx.transpose(0, 2, 1, 3).reshape(B, S, H)
    proj = ctx @ params["wo"] + params["bo"]
    y = proj + x
    mu = jnp.mean(y, axis=-1, keepdims=True)
    var = jnp.mean((y - mu) ** 2, axis=-1, keepdims=True)
    y = (y - mu) / jnp.sqrt(var + LN_EPS)
    return params["gamma"] * y + params["beta"]


def make_params(key):
    ks = jax.random.split(key, 8)
    s = 0.02
    return {
        "wq": s * jax.random.normal(ks[0], (HIDDEN, HIDDEN), jnp.float32),
        "bq": s * jax.random.normal(ks[1], (1, HIDDEN), jnp.float32),
        "wk": s * jax.random.normal(ks[2], (HIDDEN, HIDDEN), jnp.float32),
        "bk": s * jax.random.normal(ks[3], (1, HIDDEN), jnp.float32),
        "wv": s * jax.random.normal(ks[4], (HIDDEN, HIDDEN), jnp.float32),
        "bv": s * jax.random.normal(ks[5], (1, HIDDEN), jnp.float32),
        "wo": s * jax.random.normal(ks[6], (HIDDEN, HIDDEN), jnp.float32),
        "bo": s * jax.random.normal(ks[7], (1, HIDDEN), jnp.float32),
        "gamma": jnp.ones((1, HIDDEN), jnp.float32),
        "beta": jnp.zeros((1, HIDDEN), jnp.float32),
    }


if __name__ == "__main__":
    key = jax.random.PRNGKey(0)
    kx, km, kp = jax.random.split(key, 3)

    x = jax.random.normal(kx, (BATCH, SEQ, HIDDEN), jnp.float32)
    # additive attention mask: 0 for attend, -10000 for masked (BERT style)
    keep = (jax.random.uniform(km, (BATCH, 1, 1, SEQ)) > 0.2).astype(jnp.float32)
    mask = (1.0 - keep) * -10000.0
    params = make_params(kp)
    packed = pack_params(params)        # one-time, parameter-load-time packing

    out = jax.block_until_ready(bert_attention(x, mask, packed))
    ref = jax.block_until_ready(reference(x, mask, params))

    assert out.shape == (BATCH, SEQ, HIDDEN)
    # Tolerance accommodates the EUP approximate reciprocal in the softmax;
    # all other math is exact f32.
    np.testing.assert_allclose(np.asarray(out), np.asarray(ref),
                               rtol=2e-4, atol=2e-4)
    print("KERNEL_OK")
</pallas_src>

<mosaic_0001>
module attributes {stable_mosaic.version = 11 : i64} {
  func.func @bert_attention_kernel(%arg0: i32, %arg1: memref<1x8x32xf32, #tpu.memory_space<vmem>>, %arg2: memref<1x1x8xf32, #tpu.memory_space<vmem>>, %arg3: memref<32x96xf32, #tpu.memory_space<vmem>>, %arg4: memref<1x96xf32, #tpu.memory_space<vmem>>, %arg5: memref<32x32xf32, #tpu.memory_space<vmem>>, %arg6: memref<1x32xf32, #tpu.memory_space<vmem>>, %arg7: memref<1x32xf32, #tpu.memory_space<vmem>>, %arg8: memref<1x32xf32, #tpu.memory_space<vmem>>, %arg9: memref<1x8x32xf32, #tpu.memory_space<vmem>>) attributes {dimension_semantics = [#tpu.dimension_semantics<parallel>], iteration_bounds = array<i64: 2>, scalar_prefetch = 0 : i64, scratch_operands = 0 : i64, tpu.core_type = #tpu.core_type<tc>, window_params = [{transform_indices = @transform_0, window_bounds = array<i64: 1, 8, 32>}, {transform_indices = @transform_1, window_bounds = array<i64: 1, 1, 8>}, {pipeline_mode = #tpu.pipeline_mode<synchronous>, transform_indices = @transform_2, window_bounds = array<i64: 32, 96>}, {pipeline_mode = #tpu.pipeline_mode<synchronous>, transform_indices = @transform_3, window_bounds = array<i64: 1, 96>}, {pipeline_mode = #tpu.pipeline_mode<synchronous>, transform_indices = @transform_4, window_bounds = array<i64: 32, 32>}, {pipeline_mode = #tpu.pipeline_mode<synchronous>, transform_indices = @transform_5, window_bounds = array<i64: 1, 32>}, {pipeline_mode = #tpu.pipeline_mode<synchronous>, transform_indices = @transform_6, window_bounds = array<i64: 1, 32>}, {pipeline_mode = #tpu.pipeline_mode<synchronous>, transform_indices = @transform_7, window_bounds = array<i64: 1, 32>}, {transform_indices = @transform_8, window_bounds = array<i64: 1, 8, 32>}]} {
    %c0 = arith.constant 0 : index
    %c0_0 = arith.constant 0 : index
    %c0_1 = arith.constant 0 : index
    %0 = vector.load %arg1[%c0, %c0_0, %c0_1] : memref<1x8x32xf32, #tpu.memory_space<vmem>>, vector<1x8x32xf32>
    %1 = vector.shape_cast %0 : vector<1x8x32xf32> to vector<8x32xf32>
    %c0_2 = arith.constant 0 : index
    %c0_3 = arith.constant 0 : index
    %2 = vector.load %arg3[%c0_2, %c0_3] : memref<32x96xf32, #tpu.memory_space<vmem>>, vector<32x96xf32>
    %cst = arith.constant dense<0.000000e+00> : vector<8x96xf32>
    %3 = tpu.matmul %1, %2, %cst {dimension_numbers = #tpu.dot_dimension_numbers<[1], [0], [0], [1], [0, 0, 1, 1], [], []>} : vector<8x32xf32>, vector<32x96xf32>, vector<8x96xf32> -> vector<8x96xf32>
    %c0_4 = arith.constant 0 : index
    %c0_5 = arith.constant 0 : index
    %4 = vector.load %arg4[%c0_4, %c0_5] : memref<1x96xf32, #tpu.memory_space<vmem>>, vector<1x96xf32>
    %5 = vector.broadcast %4 : vector<1x96xf32> to vector<8x96xf32>
    %6 = arith.addf %3, %5 : vector<8x96xf32>
    %7 = vector.extract_strided_slice %6 {offsets = [0, 0], sizes = [8, 24], strides = [1, 1]} : vector<8x96xf32> to vector<8x24xf32>
    %8 = vector.extract_strided_slice %6 {offsets = [0, 24], sizes = [8, 24], strides = [1, 1]} : vector<8x96xf32> to vector<8x24xf32>
    %9 = vector.extract_strided_slice %6 {offsets = [0, 48], sizes = [8, 24], strides = [1, 1]} : vector<8x96xf32> to vector<8x24xf32>
    %10 = vector.extract_strided_slice %6 {offsets = [0, 72], sizes = [8, 24], strides = [1, 1]} : vector<8x96xf32> to vector<8x24xf32>
    %11 = vector.shape_cast %7 : vector<8x24xf32> to vector<1x8x24xf32>
    %12 = vector.shape_cast %8 : vector<8x24xf32> to vector<1x8x24xf32>
    %13 = vector.shape_cast %9 : vector<8x24xf32> to vector<1x8x24xf32>
    %14 = vector.shape_cast %10 : vector<8x24xf32> to vector<1x8x24xf32>
    %15 = tpu.concatenate %11, %12, %13, %14 in 0 : vector<1x8x24xf32>, vector<1x8x24xf32>, vector<1x8x24xf32>, vector<1x8x24xf32> -> vector<4x8x24xf32>
    %16 = vector.extract_strided_slice %15 {offsets = [0, 0, 0], sizes = [4, 8, 8], strides = [1, 1, 1]} : vector<4x8x24xf32> to vector<4x8x8xf32>
    %17 = vector.extract_strided_slice %15 {offsets = [0, 0, 8], sizes = [4, 8, 8], strides = [1, 1, 1]} : vector<4x8x24xf32> to vector<4x8x8xf32>
    %18 = vector.extract_strided_slice %15 {offsets = [0, 0, 16], sizes = [4, 8, 8], strides = [1, 1, 1]} : vector<4x8x24xf32> to vector<4x8x8xf32>
    %cst_6 = arith.constant dense<0.000000e+00> : vector<4x8x8xf32>
    %19 = tpu.matmul %16, %17, %cst_6 {dimension_numbers = #tpu.dot_dimension_numbers<[2], [2], [1], [1], [0, 0, 0, 1, 1, 1], [0], [0]>} : vector<4x8x8xf32>, vector<4x8x8xf32>, vector<4x8x8xf32> -> vector<4x8x8xf32>
    %cst_7 = arith.constant 0.353553385 : f32
    %20 = vector.broadcast %cst_7 : f32 to vector<4x8x8xf32>
    %21 = arith.mulf %19, %20 : vector<4x8x8xf32>
    %c0_8 = arith.constant 0 : index
    %c0_9 = arith.constant 0 : index
    %c0_10 = arith.constant 0 : index
    %22 = vector.load %arg2[%c0_8, %c0_9, %c0_10] : memref<1x1x8xf32, #tpu.memory_space<vmem>>, vector<1x1x8xf32>
    %23 = vector.shape_cast %22 : vector<1x1x8xf32> to vector<1x8xf32>
    %24 = vector.shape_cast %23 : vector<1x8xf32> to vector<1x1x8xf32>
    %25 = vector.broadcast %24 : vector<1x1x8xf32> to vector<4x8x8xf32>
    %26 = arith.addf %21, %25 : vector<4x8x8xf32>
    %cst_11 = arith.constant dense<0xFF800000> : vector<4x8xf32>
    %27 = vector.multi_reduction <maximumf>, %26, %cst_11 [2] : vector<4x8x8xf32> to vector<4x8xf32>
    %28 = vector.shape_cast %27 : vector<4x8xf32> to vector<4x8x1xf32>
    %29 = vector.broadcast %28 : vector<4x8x1xf32> to vector<4x8x8xf32>
    %30 = arith.subf %26, %29 : vector<4x8x8xf32>
    %31 = math.exp %30 : vector<4x8x8xf32>
    %cst_12 = arith.constant dense<0.000000e+00> : vector<4x8xf32>
    %32 = vector.multi_reduction <add>, %31, %cst_12 [2] : vector<4x8x8xf32> to vector<4x8xf32>
    %33 = vector.shape_cast %32 : vector<4x8xf32> to vector<4x8x1xf32>
    %34 = tpu.reciprocal %33 {approx = true} : vector<4x8x1xf32> -> vector<4x8x1xf32>
    %35 = vector.broadcast %34 : vector<4x8x1xf32> to vector<4x8x8xf32>
    %36 = arith.mulf %31, %35 : vector<4x8x8xf32>
    %cst_13 = arith.constant dense<0.000000e+00> : vector<4x8x8xf32>
    %37 = tpu.matmul %36, %18, %cst_13 {dimension_numbers = #tpu.dot_dimension_numbers<[2], [1], [1], [2], [0, 0, 0, 1, 1, 2], [0], [0]>} : vector<4x8x8xf32>, vector<4x8x8xf32>, vector<4x8x8xf32> -> vector<4x8x8xf32>
    %38 = vector.extract_strided_slice %37 {offsets = [0, 0, 0], sizes = [1, 8, 8], strides = [1, 1, 1]} : vector<4x8x8xf32> to vector<1x8x8xf32>
    %39 = vector.shape_cast %38 : vector<1x8x8xf32> to vector<8x8xf32>
    %40 = vector.extract_strided_slice %37 {offsets = [1, 0, 0], sizes = [1, 8, 8], strides = [1, 1, 1]} : vector<4x8x8xf32> to vector<1x8x8xf32>
    %41 = vector.shape_cast %40 : vector<1x8x8xf32> to vector<8x8xf32>
    %42 = vector.extract_strided_slice %37 {offsets = [2, 0, 0], sizes = [1, 8, 8], strides = [1, 1, 1]} : vector<4x8x8xf32> to vector<1x8x8xf32>
    %43 = vector.shape_cast %42 : vector<1x8x8xf32> to vector<8x8xf32>
    %44 = vector.extract_strided_slice %37 {offsets = [3, 0, 0], sizes = [1, 8, 8], strides = [1, 1, 1]} : vector<4x8x8xf32> to vector<1x8x8xf32>
    %45 = vector.shape_cast %44 : vector<1x8x8xf32> to vector<8x8xf32>
    %46 = tpu.concatenate %39, %41, %43, %45 in 1 : vector<8x8xf32>, vector<8x8xf32>, vector<8x8xf32>, vector<8x8xf32> -> vector<8x32xf32>
    %c0_14 = arith.constant 0 : index
    %c0_15 = arith.constant 0 : index
    %47 = vector.load %arg5[%c0_14, %c0_15] : memref<32x32xf32, #tpu.memory_space<vmem>>, vector<32x32xf32>
    %cst_16 = arith.constant dense<0.000000e+00> : vector<8x32xf32>
    %48 = tpu.matmul %46, %47, %cst_16 {dimension_numbers = #tpu.dot_dimension_numbers<[1], [0], [0], [1], [0, 0, 1, 1], [], []>} : vector<8x32xf32>, vector<32x32xf32>, vector<8x32xf32> -> vector<8x32xf32>
    %c0_17 = arith.constant 0 : index
    %c0_18 = arith.constant 0 : index
    %49 = vector.load %arg6[%c0_17, %c0_18] : memref<1x32xf32, #tpu.memory_space<vmem>>, vector<1x32xf32>
    %50 = vector.broadcast %49 : vector<1x32xf32> to vector<8x32xf32>
    %51 = arith.addf %48, %50 : vector<8x32xf32>
    %52 = arith.addf %51, %1 : vector<8x32xf32>
    %cst_19 = arith.constant dense<0.000000e+00> : vector<8xf32>
    %53 = vector.multi_reduction <add>, %52, %cst_19 [1] : vector<8x32xf32> to vector<8xf32>
    %54 = vector.shape_cast %53 : vector<8xf32> to vector<8x1xf32>
    %cst_20 = arith.constant 3.200000e+01 : f32
    %55 = vector.broadcast %cst_20 : f32 to vector<8x1xf32>
    %56 = arith.divf %54, %55 : vector<8x1xf32>
    %57 = vector.broadcast %56 : vector<8x1xf32> to vector<8x32xf32>
    %58 = arith.subf %52, %57 : vector<8x32xf32>
    %59 = arith.mulf %58, %58 : vector<8x32xf32>
    %cst_21 = arith.constant dense<0.000000e+00> : vector<8xf32>
    %60 = vector.multi_reduction <add>, %59, %cst_21 [1] : vector<8x32xf32> to vector<8xf32>
    %61 = vector.shape_cast %60 : vector<8xf32> to vector<8x1xf32>
    %cst_22 = arith.constant 3.200000e+01 : f32
    %62 = vector.broadcast %cst_22 : f32 to vector<8x1xf32>
    %63 = arith.divf %61, %62 : vector<8x1xf32>
    %64 = vector.broadcast %56 : vector<8x1xf32> to vector<8x32xf32>
    %65 = arith.subf %52, %64 : vector<8x32xf32>
    %cst_23 = arith.constant 9.99999996E-13 : f32
    %66 = vector.broadcast %cst_23 : f32 to vector<8x1xf32>
    %67 = arith.addf %63, %66 : vector<8x1xf32>
    %68 = math.rsqrt %67 : vector<8x1xf32>
    %69 = vector.broadcast %68 : vector<8x1xf32> to vector<8x32xf32>
    %70 = arith.mulf %65, %69 : vector<8x32xf32>
    %c0_24 = arith.constant 0 : index
    %c0_25 = arith.constant 0 : index
    %71 = vector.load %arg7[%c0_24, %c0_25] : memref<1x32xf32, #tpu.memory_space<vmem>>, vector<1x32xf32>
    %72 = vector.broadcast %71 : vector<1x32xf32> to vector<8x32xf32>
    %73 = arith.mulf %72, %70 : vector<8x32xf32>
    %c0_26 = arith.constant 0 : index
    %c0_27 = arith.constant 0 : index
    %74 = vector.load %arg8[%c0_26, %c0_27] : memref<1x32xf32, #tpu.memory_space<vmem>>, vector<1x32xf32>
    %75 = vector.broadcast %74 : vector<1x32xf32> to vector<8x32xf32>
    %76 = arith.addf %73, %75 : vector<8x32xf32>
    %c0_28 = arith.constant 0 : index
    %c0_29 = arith.constant 0 : index
    %c0_30 = arith.constant 0 : index
    %77 = vector.load %arg9[%c0_28, %c0_29, %c0_30] : memref<1x8x32xf32, #tpu.memory_space<vmem>>, vector<1x8x32xf32>
    %78 = vector.shape_cast %77 : vector<1x8x32xf32> to vector<8x32xf32>
    %79 = vector.shape_cast %76 : vector<8x32xf32> to vector<1x8x32xf32>
    tpu.vector_store %arg9[%c0_28, %c0_29, %c0_30], %79 {strides = array<i32>} : memref<1x8x32xf32, #tpu.memory_space<vmem>>, vector<1x8x32xf32>,
    return
  }
  func.func @transform_0(%arg0: i32) -> (i32, i32, i32) {
    %c0_i32 = arith.constant 0 : i32
    %c0_i32_0 = arith.constant 0 : i32
    %c0_i32_1 = arith.constant 0 : i32
    return %arg0, %c0_i32, %c0_i32_0 : i32, i32, i32
  }
  func.func @transform_1(%arg0: i32) -> (i32, i32, i32) {
    %c0_i32 = arith.constant 0 : i32
    %c0_i32_0 = arith.constant 0 : i32
    %c0_i32_1 = arith.constant 0 : i32
    return %arg0, %c0_i32, %c0_i32_0 : i32, i32, i32
  }
  func.func @transform_2(%arg0: i32) -> (i32, i32) {
    %c0_i32 = arith.constant 0 : i32
    %c0_i32_0 = arith.constant 0 : i32
    %c0_i32_1 = arith.constant 0 : i32
    return %c0_i32, %c0_i32_0 : i32, i32
  }
  func.func @transform_3(%arg0: i32) -> (i32, i32) {
    %c0_i32 = arith.constant 0 : i32
    %c0_i32_0 = arith.constant 0 : i32
    %c0_i32_1 = arith.constant 0 : i32
    return %c0_i32, %c0_i32_0 : i32, i32
  }
  func.func @transform_4(%arg0: i32) -> (i32, i32) {
    %c0_i32 = arith.constant 0 : i32
    %c0_i32_0 = arith.constant 0 : i32
    %c0_i32_1 = arith.constant 0 : i32
    return %c0_i32, %c0_i32_0 : i32, i32
  }
  func.func @transform_5(%arg0: i32) -> (i32, i32) {
    %c0_i32 = arith.constant 0 : i32
    %c0_i32_0 = arith.constant 0 : i32
    %c0_i32_1 = arith.constant 0 : i32
    return %c0_i32, %c0_i32_0 : i32, i32
  }
  func.func @transform_6(%arg0: i32) -> (i32, i32) {
    %c0_i32 = arith.constant 0 : i32
    %c0_i32_0 = arith.constant 0 : i32
    %c0_i32_1 = arith.constant 0 : i32
    return %c0_i32, %c0_i32_0 : i32, i32
  }
  func.func @transform_7(%arg0: i32) -> (i32, i32) {
    %c0_i32 = arith.constant 0 : i32
    %c0_i32_0 = arith.constant 0 : i32
    %c0_i32_1 = arith.constant 0 : i32
    return %c0_i32, %c0_i32_0 : i32, i32
  }
  func.func @transform_8(%arg0: i32) -> (i32, i32, i32) {
    %c0_i32 = arith.constant 0 : i32
    %c0_i32_0 = arith.constant 0 : i32
    %c0_i32_1 = arith.constant 0 : i32
    return %arg0, %c0_i32, %c0_i32_0 : i32, i32, i32
  }
}

</mosaic_0001>

<bundles_post_ra>
// kernel: bert_attention.1
= control target key start
LH: loop header
LB: loop body
LE: loop exit
PB: predicated region body
PF: predicated region fallthrough
CT: control target
= control target key end

     0   :  { %13 = vsyncpa [#allocation3], 0  ;;  %s2157_s0 = inlined_call_operand.hbm [shape: f32[2,8,32], index: 0, kind: input, shape index: {}]   ;;  %s2158_s1 = inlined_call_operand.vmem [shape: f32[2,1,8], index: 1, kind: input, shape index: {}]   ;;  %s2159_s2 = inlined_call_operand.hbm [shape: f32[32,96], index: 2, kind: input, shape index: {}]   ;;  %s2160_s3 = inlined_call_operand.vmem [shape: f32[1,96], index: 3, kind: input, shape index: {}]   ;;  %s2161_s4 = inlined_call_operand.hbm [shape: f32[32,32], index: 4, kind: input, shape index: {}]   ;;  %s2162_s5 = inlined_call_operand.vmem [shape: f32[1,32], index: 5, kind: input, shape index: {}]   ;;  %s2163_s6 = inlined_call_operand.vmem [shape: f32[1,32], index: 6, kind: input, shape index: {}]   ;;  %s2164_s7 = inlined_call_operand.vmem [shape: f32[1,32], index: 7, kind: input, shape index: {}]   ;;  %s2165_s8 = inlined_call_operand.hbm [shape: f32[2,8,32], index: 8, kind: output, shape index: {}]  }
   0x1   :  { %15 = vsyncpa [#allocation3 + $0x1], 0 }
   0x2   :  { %16 = vsyncpa [#allocation6], 0 }
   0x3   :  { %17 = vsyncpa [#allocation4], 0 }
   0x4   :  { %19 = vsyncpa [#allocation4 + $0x1], 0  ;;  %s1823_s27 = smov 0   ;;  %s1825_s28 = smov 0  }
   0x5   :  { %s1827_s29 = smov 0   ;;  %s1829_s30 = smov 0  }
   0x6 LB: > { %s1844_s9 = sadd.s32 4294967295, %s1759_s30   ;;  %s1370_s10 = sadd.s32 4294967294, %s1759_s30   ;;  %s1759_s30 = sphi %s1829_s30, %s2185_s30   ;;  %s1755_s29 = sphi %s1827_s29, %s2184_s29   ;;  %s1751_s28 = sphi %s1825_s28, %s2183_s28   ;;  %s1747_s27 = sphi %s1823_s27, %s2182_s27  }
   0x7   : > { %p45_p0 = scmp.ne.s32.totalorder %s1751_s28, %s1747_s27  ;;  %p2166_p1 = scmp.eq.s32.totalorder %s1844_s9, 0 }
   0x8   : > { %p227_p3 = scmp.eq.s32.totalorder %s1370_s10, 1  ;;  %p1371_p5 = scmp.ge.s32.totalorder %s1759_s30, 1 }
   0x9   : > { %p1853_p4 = por %p2166_p1, %p45_p0  ;;  %p234_p7 = scmp.lt.s32.totalorder %s1759_s30, 3 }
   0xa   : > { %p1858_p6 = por %p227_p3, %p45_p0  ;;  %s1761_s14 = smov [#allocation5]  }
   0xb   : > { %s2169_s11 = scalar_select %p1853_p4, 1, 0 }
   0xc   : > { %s2170_s12 = scalar_select %p1858_p6, 1, 0 }
   0xd   : > { %p1863_p8 = pnand %p1371_p5, %p234_p7  ;;  %s246_s15 = sshll.u32 %s1761_s14, 4  ;;  %s1867_s15 = int_to_ptr.vmem [resolvable:$true] %s246_s15 }
   0xe   : > { %s1762_s17 = smov [#allocation7]   ;;  %s1603_s21 = scalar_lea.hbm %s2159_s2, 512 }
   0xf   : > { %p1517_p9 = pneg %p1863_p8  ;;  %s262_s18 = sshll.u32 %s1762_s17, 4  ;;  %s1878_s18 = int_to_ptr.vmem [resolvable:$true] %s262_s18 }
  0x10   : > { %p1604_p12 = scmp.ne.s32.totalorder %s2159_s2, %s1603_s21  ;;  %p1610_p5 = scmp.lt.u32.totalorder %s1603_s21, %s2159_s2 }
  0x11   : > { %p1874_p11 = pnand %p1517_p9, %p2166_p1 }
  0x13   : > { %p1605_p13 = pneg %p1874_p11 }
  0x15   : > { %p1606_p0 = pnand %p1605_p13, %p1604_p12 }
  0x17   : > { %p1607_p3 = pneg %p1606_p0 }
  0x19   : > { %p1612_p7 = pnand %p1610_p5, %p1607_p3 }
  0x1b   : > { %1615 = shalt.err (!%p1612_p7)
}
  0x1c   : > { %s1616_s26 = scalar_lea.vmem %s1867_s15, 512  ;;  %p1624_p2 = scmp.lt.s32.totalorder %s1867_s15, %s1867_s15 }
  0x1d   : > { %p1617_p9 = scmp.ne.s32.totalorder %s1867_s15, %s1616_s26  ;;  %p1625_p12 = scmp.lt.s32.totalorder %s1616_s26, %s1616_s26 }
  0x1f   : > { %p1619_p10 = pnand %p1617_p9, %p1605_p13  ;;  %p1626_p0 = por %p1625_p12, %p1624_p2 }
  0x21   : > { %p1620_p1 = pneg %p1619_p10 }
  0x23   : > { %p1627_p6 = pnand %p1626_p0, %p1620_p1 }
  0x25   : > { %1630 = shalt.err (!%p1627_p6)
}
  0x26   : > { %s1763_s10 = smov 128   ;;  %s1764_s14 = smov 8  }
  0x27   : > { %1520 = dma.hbm_to_vmem [thread:$0]  (!%p1874_p11), %s2159_s2, 512, %s1867_s15, [#allocation6], %s1763_s10, %s1763_s10, %s1764_s14  }
  0x28   : > { %s1631_s22 = scalar_lea.hbm %s2161_s4, 512 }
  0x29   : > { %p1632_p2 = scmp.ne.s32.totalorder %s2161_s4, %s1631_s22  ;;  %p1638_p10 = scmp.lt.u32.totalorder %s1631_s22, %s2161_s4 }
  0x2b   : > { %p1634_p1 = pnand %p1632_p2, %p1605_p13 }
  0x2d   : > { %p1635_p6 = pneg %p1634_p1 }
  0x2f   : > { %p1640_p3 = pnand %p1638_p10, %p1635_p6 }
  0x31   : > { %1643 = shalt.err (!%p1640_p3)
}
  0x32   : > { %s1644_s15 = scalar_lea.vmem %s1878_s18, 512  ;;  %p1652_p12 = scmp.lt.s32.totalorder %s1878_s18, %s1878_s18 }
  0x33   : > { %p1645_p5 = scmp.ne.s32.totalorder %s1878_s18, %s1644_s15  ;;  %p1653_p0 = scmp.lt.s32.totalorder %s1644_s15, %s1644_s15 }
  0x35   : > { %p1647_p7 = pnand %p1645_p5, %p1605_p13  ;;  %p1654_p2 = por %p1653_p0, %p1652_p12 }
  0x37   : > { %p1648_p9 = pneg %p1647_p7 }
  0x39   : > { %p1655_p1 = pnand %p1654_p2, %p1648_p9 }
  0x3b   : > { %1658 = shalt.err (!%p1655_p1)
}
  0x3c   : > { %1523 = dma.hbm_to_vmem [thread:$0]  (!%p1874_p11), %s2161_s4, 512, %s1878_s18, [#allocation6], %s1763_s10, %s1763_s10, %s1764_s14  }
  0x3d   : > { %s1933_s20 = sadd.s32 1, %s1759_s30   ;;  %s32_s16 = sadd.s32 1, %s1755_s29 }
  0x3e   : > { %s29_s21 = ssub.s32 %s1759_s30, %s1933_s20  ;;  %p39_p13 = scmp.ne.s32.totalorder %s1755_s29, %s1751_s28 }
  0x3f   : > { %p30_p6 = scmp.eq.s32.totalorder %s29_s21, 0  ;;  %p40_p10 = scmp.eq.s32.totalorder %s1759_s30, 0 }
  0x40   : > { %p2173_p3 = scmp.eq.s32.totalorder %s1844_s9, 1  ;;  %p1534_p7 = scmp.lt.s32.totalorder %s1759_s30, 2 }
  0x41   : > { %s1949_s23 = scalar_select %p30_p6, %s1755_s29, %s32_s16  }
  0x42   : > { %p1943_p5 = por %p2173_p3, %p39_p13  ;;  %p41_p9 = por %p40_p10, %p39_p13 }
  0x43   : > { %s285_s24 = sand.u32 1, %s1755_s29   ;;  %s1376_s18 = sshll.u32 %s1759_s30, 7 }
  0x44   : > { %s2174_s22 = scalar_select %p1943_p5, 1, 0 }
  0x45   : > { %s1375_s25 = sshll.u32 %s285_s24, 3  ;;  %s1956_s26 = scalar_lea.hbm %s2157_s0, %s1376_s18 }
  0x46   : > { %s289_s15 = scalar_lea.vmem [#allocation2], %s1375_s25  ;;  %p1960_p11 = pnand %p1534_p7, %p41_p9 }
  0x47   : > { %s296_s17 = sshll.u32 %s289_s15, 4  ;;  %s286_s16 = scalar_lea.sflag [#allocation3], %s285_s24  ;;  %s1958_s17 = int_to_ptr.vmem [resolvable:$true] %s296_s17 }
  0x48   : > { %s1659_s21 = scalar_lea.hbm %s1956_s26, 128  ;;  %p1661_p0 = pneg %p1960_p11 }
  0x49   : > { %p1660_p12 = scmp.ne.s32.totalorder %s1956_s26, %s1659_s21  ;;  %s1664_s10 = scalar_lea.hbm %s2157_s0, 256 }
  0x4a   : > { %p1665_p13 = scmp.lt.u32.totalorder %s1956_s26, %s2157_s0  ;;  %p1666_p6 = scmp.lt.u32.totalorder %s1664_s10, %s1659_s21 }
  0x4b   : > { %p1662_p2 = pnand %p1661_p0, %p1660_p12  ;;  %p1668_p3 = scmp.lt.u32.totalorder %s1659_s21, %s1956_s26 }
  0x4c   : > { %p1667_p10 = por %p1666_p6, %p1665_p13 }
  0x4d   : > { %p1663_p1 = pneg %p1662_p2 }
  0x4e   : > { %p1669_p7 = por %p1668_p3, %p1667_p10 }
  0x50   : > { %p1670_p9 = pnand %p1669_p7, %p1663_p1 }
  0x52   : > { %1673 = shalt.err (!%p1670_p9)
}
  0x53   : > { %s1674_s24 = scalar_lea.vmem %s1958_s17, 128  ;;  %s1765_s18 = smov [#allocation2]  }
  0x54   : > { %p1675_p12 = scmp.ne.s32.totalorder %s1958_s17, %s1674_s24  ;;  %s1679_s25 = sshll.u32 %s1765_s18, 4  ;;  %s1680_s25 = int_to_ptr.vmem [resolvable:$false] %s1679_s25 }
  0x55   : > { %s1681_s14 = scalar_lea.vmem %s1680_s25, 256  ;;  %p1682_p4 = scmp.lt.s32.totalorder %s1958_s17, %s1680_s25 }
  0x56   : > { %p1677_p2 = pnand %p1675_p12, %p1661_p0  ;;  %p1683_p13 = scmp.lt.s32.totalorder %s1681_s14, %s1674_s24 }
  0x58   : > { %p1678_p5 = pneg %p1677_p2  ;;  %p1684_p6 = por %p1683_p13, %p1682_p4 }
  0x5a   : > { %p1685_p10 = pnand %p1684_p6, %p1678_p5 }
  0x5c   : > { %1688 = shalt.err (!%p1685_p10)
}
  0x5d   : > { %1527 = dma.hbm_to_vmem [thread:$0]  (!%p1960_p11), %s1956_s26, 128, %s1958_s17, %s286_s16  }
  0x5e   : > { %311 = sbr.rel (%p1863_p8) target bundleno = 1972 (0x7b4), region = 52  ;;  %s1992_s21 = sand.u32 (!%p1863_p8), 1, %s1751_s28  }
  0x5f   : > { %s1378_s10 = sshll.u32 (!%p1863_p8), %s1992_s21, 3  ;;  %s314_s15 = scalar_lea.sflag (!%p1863_p8), [#allocation3], %s1992_s21 }
  0x60   : > { %s317_s24 = scalar_lea.vmem (!%p1863_p8), [#allocation2], %s1378_s10  ;;  %p2176_p4 = scmp.ne.s32.totalorder (!%p1863_p8), %s2169_s11, 0 }
  0x65   : > { %1734 = dma.done.wait (%p2176_p4), %s314_s15, 128  }
  0x66   : > { %1736 = vsyncadd (%p2176_p4), %s314_s15, 4294967168  ;;  %p2177_p5 = scmp.eq.s32.totalorder %s1844_s9, 0 }
  0x68   : > { %1738 = dma.done.wait (%p2177_p5), [#allocation6], 1024   ;;  %p2178_p8 = pmov %p2177_p5 }
  0x69   : > { %v1766_v0 = vmov 0.0|0.0   ;;  %vm1767_vm0 = vmmov 0   ;;  %v1768_v1 = vmov 0.0   ;;  %v365_v2 = vld [vmem:[#allocation5] sm:$0xff]  ;;  %v366_v3 = vld [vmem:[#allocation5 + $0x8] sm:$0xff]  ;;  %v367_v4 = vld [vmem:[#allocation5 + $0x10] sm:$0xff] }
  0x6a   : > { %1740 = vsyncadd (%p2178_p8), [#allocation6], 4294966272  ;;  %1493 = vmatprep.subr.bf16.mxu0 %v1766_v0  ;;  %1439 = vmatprep.mubr.msk.f32.mxu0 %vm1767_vm0, %v1768_v1  ;;  %v1494_v5 = vpack.c.bf16 %v366_v3, %v365_v2  ;;  %v368_v6 = vld [vmem:[#allocation5 + $0x18] sm:$0xff]  ;;  %vm376_vm1 = vcmask 261120   ;;  %v1382_v9 = vld [vmem:[%s2160_s3] ss:$0 sm:$0xff] }
  0x6b   : > { %1442 = vmatprep.subr.mxu1 %v1768_v1  ;;  %1444 = vmatprep.mubr.msk.f32.mxu1 %vm1767_vm0, %v1768_v1  ;;  %v1497_v7 = vpack.c.bf16 %v368_v6, %v367_v4  ;;  %v2013_v8 = vld [vmem:[%s317_s24] sm:$0xff]  ;;  %s1769_s26 = smov 56   ;;  %s1770_s17 = smov 104   ;;  %vm459_vm2 = vcmask 64512   ;;  %vm1138_vm3 = vcmask 130048   ;;  %vm1140_vm4 = vcmask 195584  }
  0x6c   : > { %1495 = vmatpush3.bf16.msra.mxu0 %v1494_v5  ;;  %s1771_s19 = smov 120   ;;  %s1772_s16 = smov 80  }
  0x6d   : > { %1496 = vmatprep.subr.bf16.mxu0 %v1766_v0  ;;  %p361_p11 = scmp.lt.s32.totalorder %s1844_s9, 1  ;;  %s1773_s24 = smov 112  }
  0x6e   : > { %s1774_s11 = smov 8   ;;  %s1775_s13 = smov 16  }
  0x6f   : > { %s362_s18 = scalar_select %p361_p11, %s1844_s9, 1 }
  0x70   : > { %1498 = vmatpush3.bf16.msra.mxu0 %v1497_v7  ;;  %p2179_p1 = scmp.ne.s32.totalorder %s2174_s22, 0 }
  0x71   : > { %1462 = vmatprep.subr.mxu0 %v1768_v1  ;;  %s363_s15 = scalar_lea.vmem %s2158_s1, %s362_s18 }
  0x72   : > { %v1392_v21 = vld [vmem:[%s363_s15] ss:$0 sm:$0xff]  ;;  %s1402_s15 = sshll.u32 %s1844_s9, 7  ;;  %s1777_s9 = smov [#allocation8]  }
  0x73   : > { %1440 = vmatmul.mubr.msk.f32.vlgmr.msra.gmra.mrb[0].mxu0 %vm376_vm1, %v2013_v8 }
  0x74   : > { %1464 = vmatprep.mubr.msk.f32.mxu0 %vm1767_vm0, %v1768_v1 }
 0x146   : > { %v446_v10 = vpop.f32.mrb[0].mxu0 }
 0x147   : > { %v2023_v11 = vadd.f32 %v1382_v9, %v446_v10  ;;  %v1441_v12 = vpop.f32.mrb[1].mxu0 }
 0x149   : > { %455 = vrot.lane.b32.xlu1 %v2023_v11, %s1769_s26  ;;  %451 = vrot.lane.b32.xlu0 %v2023_v11, %s1770_s17  ;;  %s1776_s26 = smov 24   ;;  %s2112_s17 = scalar_lea.hbm %s2165_s8, %s1402_s15 }
 0x14d   : > { %457 = vrot.lane.b32.xlu1 %v2023_v11, %s1771_s19  ;;  %453 = vrot.lane.b32.xlu0 %v2023_v11, %s1772_s16 }
 0x1bb   : > { %v2029_v13 = vpop.permute.xlu1 %455  ;;  %v452_v14 = vpop.permute.xlu0 %451 }
 0x1bc   : > { %534 = vrot.lane.b32.xlu0 %v452_v14, %s1771_s19 }
 0x1bf   : > { %v458_v15 = vpop.permute.xlu1 %457  ;;  %v2031_v16 = vpop.permute.xlu0 %453 }
 0x1c0   : > { %1443 = vmatpush3.xpose.msk.msra.mxu1 %vm459_vm2, %v458_v15  ;;  %686 = vrot.lane.b32.xlu0 %v2029_v13, %s1771_s19 }
 0x1c1   : > { %610 = vrot.lane.b32.xlu1 %v2031_v16, %s1771_s19  ;;  %1447 = vmatprep.subr.mxu1 %v1768_v1  ;;  %s1259_s19 = scalar_lea.sflag [#allocation4], %s1992_s21 }
 0x1c3   : > { %1445 = vmatmul.mubr.msk.f32.vlgmr.msra.gmra.mrb[0].mxu1 %vm459_vm2, %v2023_v11 }
 0x1c4   : > { %1449 = vmatprep.mubr.msk.f32.mxu1 %vm1767_vm0, %v1768_v1 }
 0x22e   : > { %v535_v17 = vpop.permute.xlu0 %534 }
 0x22f   : > { %1448 = vmatpush3.xpose.msk.msra.mxu1 %vm459_vm2, %v535_v17 }
 0x230   : > { %1452 = vmatprep.subr.mxu1 %v1768_v1 }
 0x232   : > { %1450 = vmatmul.mubr.msk.f32.vlgmr.msra.gmra.mrb[2].mxu1 %vm459_vm2, %v452_v14  ;;  %v687_v19 = vpop.permute.xlu0 %686 }
 0x233   : > { %v611_v18 = vpop.permute.xlu1 %610  ;;  %1454 = vmatprep.mubr.msk.f32.mxu1 %vm1767_vm0, %v1768_v1 }
 0x234   : > { %1453 = vmatpush3.xpose.msk.msra.mxu1 %vm459_vm2, %v611_v18  ;;  %v1142_v18 = vld [vmem:[#allocation7] sm:$0xff] }
 0x235   : > { %1457 = vmatprep.subr.mxu1 %v1768_v1 }
 0x237   : > { %1455 = vmatmul.mubr.msk.f32.vlgmr.msra.gmra.mrb[4].mxu1 %vm459_vm2, %v2031_v16 }
 0x238   : > { %1458 = vmatpush3.xpose.msk.msra.mxu1 %vm459_vm2, %v687_v19  ;;  %1459 = vmatprep.mubr.msk.f32.mxu1 %vm1767_vm0, %v1768_v1  ;;  %v1143_v19 = vld [vmem:[#allocation7 + $0x8] sm:$0xff] }
 0x239   : > { %1467 = vmatprep.subr.mxu1 %v1768_v1 }
 0x23b   : > { %1460 = vmatmul.mubr.msk.f32.vlgmr.msra.gmra.mrb[6].mxu1 %vm459_vm2, %v2029_v13 }
 0x23c   : > { %1469 = vmatprep.mubr.msk.f32.mxu1 %vm1767_vm0, %v1768_v1 }
 0x296   : > { %v530_v20 = vpop.f32.mrb[0].mxu1 }
 0x297   : > { %v762_v22 = vmul.f32 0.35355338, %v530_v20  ;;  %v1446_v23 = vpop.f32.mrb[1].mxu1  ;;  %v1500_v20 = vpack.c.bf16 %v1143_v19, %v1142_v18 }
 0x299   : > { %v773_v24 = vadd.f32 %v1392_v21, %v762_v22  ;;  %v1145_v22 = vld [vmem:[#allocation7 + $0x18] sm:$0xff] }
 0x29b   : > { %v777_v25 = vsel %vm459_vm2, %v773_v24, -inf }
 0x29c   : > { %778 = vmax.xlane.f32.xlu1 %v777_v25 }
 0x305   : > { %v606_v26 = vpop.f32.mrb[2].mxu1 }
 0x306   : > { %v763_v27 = vmul.f32 0.35355338, %v606_v26  ;;  %v1451_v28 = vpop.f32.mrb[3].mxu1 }
 0x308   : > { %v774_v29 = vadd.f32 %v1392_v21, %v763_v27 }
 0x30a   : > { %v682_v30 = vpop.f32.mrb[4].mxu1  ;;  %v780_v31 = vsel %vm459_vm2, %v774_v29, -inf }
 0x30b   : > { %v764_v32 = vmul.f32 0.35355338, %v682_v30  ;;  %v1456_v33 = vpop.f32.mrb[5].mxu1  ;;  %781 = vmax.xlane.f32.xlu0 %v780_v31 }
 0x30d   : > { %v775_v34 = vadd.f32 %v1392_v21, %v764_v32 }
 0x30e   : > { %v758_v35 = vpop.f32.mrb[6].mxu1 }
 0x30f   : > { %v765_v36 = vmul.f32 0.35355338, %v758_v35  ;;  %v1461_v37 = vpop.f32.mrb[7].mxu1  ;;  %v783_v38 = vsel %vm459_vm2, %v775_v34, -inf }
 0x310   : > { %784 = vmax.xlane.f32.xlu0 %v783_v38 }
 0x311   : > { %v776_v39 = vadd.f32 %v1392_v21, %v765_v36  ;;  %v1144_v21 = vld [vmem:[#allocation7 + $0x10] sm:$0xff] }
 0x312   : > { %v1503_v23 = vpack.c.bf16 %v1145_v22, %v1144_v21 }
 0x313   : > { %v786_v40 = vsel %vm459_vm2, %v776_v39, -inf }
 0x314   : > { %787 = vmax.xlane.f32.xlu1 %v786_v40 }
 0x325   : > { %897 = vrot.lane.b32.xlu1 %v452_v14, %s1773_s24 }
 0x326   : > { %821 = vrot.lane.b32.xlu0 %v2023_v11, %s1773_s24 }
 0x329   : > { %v779_v41 = vpop.xlane.xlu1 %778 }
 0x32a   : > { %v789_v42 = vsub.f32 %v773_v24, %v779_v41 }
 0x32c   : > { %v793_v43 = vmul.f32 1.442695, %v789_v42 }
 0x32e   : > { %1585 = vpow2.f32 %v793_v43 }
 0x338   : > { %v1586_v44 = vpop.eup %1585 }
 0x339   : > { %v801_v45 = vsel %vm459_vm2, %v1586_v44, 0.0 }
 0x345   : > { %802 = vadd.xlane.f32.xlu0 %v801_v45 }
 0x398   : > { %v782_v46 = vpop.xlane.xlu0 %781 }
 0x399   : > { %v790_v47 = vsub.f32 %v774_v29, %v782_v46 }
 0x39b   : > { %v795_v48 = vmul.f32 1.442695, %v790_v47 }
 0x39d   : > { %1587 = vpow2.f32 %v795_v48  ;;  %v785_v49 = vpop.xlane.xlu0 %784 }
 0x39e   : > { %v791_v50 = vsub.f32 %v775_v34, %v785_v49  ;;  %v1397_v34 = vld [vmem:[%s2162_s5] ss:$0 sm:$0xff] }
 0x3a0   : > { %v797_v51 = vmul.f32 1.442695, %v791_v50  ;;  %v1400_v50 = vld [vmem:[%s2164_s7] ss:$0 sm:$0xff] }
 0x3a1   : > { %v788_v52 = vpop.xlane.xlu1 %787  ;;  %v822_v53 = vpop.permute.xlu0 %821 }
 0x3a2   : > { %1589 = vpow2.f32 %v797_v51  ;;  %v792_v54 = vsub.f32 %v776_v39, %v788_v52  ;;  %1463 = vmatpush3.msra.mxu0 %v822_v53 }
 0x3a3   : > { %1472 = vmatprep.subr.mxu0 %v1768_v1 }
 0x3a4   : > { %v799_v55 = vmul.f32 1.442695, %v792_v54 }
 0x3a5   : > { %v898_v56 = vpop.permute.xlu1 %897 }
 0x3a6   : > { %1591 = vpow2.f32 %v799_v55  ;;  %1468 = vmatpush3.msra.mxu1 %v898_v56 }
 0x3a7   : > { %v1588_v57 = vpop.eup %1587  ;;  %1477 = vmatprep.subr.mxu1 %v1768_v1 }
 0x3a8   : > { %v804_v58 = vsel %vm459_vm2, %v1588_v57, 0.0 }
 0x3a9   : > { %805 = vadd.xlane.f32.xlu1 %v804_v58 }
 0x3ac   : > { %v1590_v59 = vpop.eup %1589 }
 0x3ad   : > { %v807_v60 = vsel %vm459_vm2, %v1590_v59, 0.0 }
 0x3ae   : > { %808 = vadd.xlane.f32.xlu0 %v807_v60 }
 0x3b0   : > { %v1592_v61 = vpop.eup %1591 }
 0x3b1   : > { %v810_v62 = vsel %vm459_vm2, %v1592_v61, 0.0 }
 0x3b2   : > { %811 = vadd.xlane.f32.xlu1 %v810_v62 }
 0x3c3   : > { %973 = vrot.lane.b32.xlu1 %v2031_v16, %s1773_s24 }
 0x3c4   : > { %1049 = vrot.lane.b32.xlu0 %v2029_v13, %s1773_s24  ;;  %s360_s24 = scalar_lea.vmem [#allocation8], %s1378_s10  ;;  %s1693_s10 = sshll.u32 %s1777_s9, 4  ;;  %s1694_s10 = int_to_ptr.vmem [resolvable:$false] %s1693_s10 }
 0x3c5   : > { %s1695_s18 = scalar_lea.vmem %s1694_s10, 256 }
 0x3d2   : > { %v803_v63 = vpop.xlane.xlu0 %802 }
 0x3d3   : > { %1593 = vrcp.f32 %v803_v63 }
 0x3dd   : > { %v1594_v2 = vpop.eup %1593 }
 0x3de   : > { %v817_v3 = vmul.f32 %v1594_v2, %v1586_v44 }
 0x3e0   : > { %1465 = vmatmul.mubr.msk.f32.vlgmr.msra.gmra.mrb[2].mxu0 %vm459_vm2, %v817_v3 }
 0x3e1   : > { %1474 = vmatprep.mubr.msk.f32.mxu0 %vm1767_vm0, %v1768_v1 }
 0x436   : > { %v806_v4 = vpop.xlane.xlu1 %805 }
 0x437   : > { %1595 = vrcp.f32 %v806_v4 }
 0x43b   : > { %v809_v5 = vpop.xlane.xlu0 %808 }
 0x43c   : > { %1597 = vrcp.f32 %v809_v5 }
 0x43f   : > { %v812_v6 = vpop.xlane.xlu1 %811  ;;  %v1050_v11 = vpop.permute.xlu0 %1049 }
 0x440   : > { %1599 = vrcp.f32 %v812_v6 }
 0x441   : > { %v1596_v7 = vpop.eup %1595 }
 0x442   : > { %v818_v9 = vmul.f32 %v1596_v7, %v1588_v57 }
 0x443   : > { %v974_v10 = vpop.permute.xlu1 %973 }
 0x444   : > { %1473 = vmatpush3.msra.mxu0 %v974_v10  ;;  %1470 = vmatmul.mubr.msk.f32.vlgmr.msra.gmra.mrb[8].mxu1 %vm459_vm2, %v818_v9 }
 0x445   : > { %1478 = vmatpush3.msra.mxu1 %v1050_v11  ;;  %1479 = vmatprep.mubr.msk.f32.mxu1 %vm1767_vm0, %v1768_v1 }
 0x446   : > { %v1598_v12 = vpop.eup %1597  ;;  %1499 = vmatprep.subr.bf16.mxu0 %v1766_v0 }
 0x447   : > { %v819_v13 = vmul.f32 %v1598_v12, %v1590_v59 }
 0x449   : > { %1475 = vmatmul.mubr.msk.f32.vlgmr.msra.gmra.mrb[4].mxu0 %vm459_vm2, %v819_v13 }
 0x44a   : > { %v1600_v14 = vpop.eup %1599  ;;  %1490 = vmatprep.mubr.msk.f32.mxu0 %vm1767_vm0, %v1768_v1  ;;  %1501 = vmatpush3.bf16.msra.mxu0 %v1500_v20 }
 0x44b   : > { %v820_v15 = vmul.f32 %v1600_v14, %v1592_v61  ;;  %1502 = vmatprep.subr.bf16.mxu0 %v1766_v0 }
 0x44d   : > { %1480 = vmatmul.mubr.msk.f32.vlgmr.msra.gmra.mrb[10].mxu1 %vm459_vm2, %v820_v15 }
 0x44e   : > { %1504 = vmatpush3.bf16.msra.mxu0 %v1503_v23 }
 0x4b3   : > { %v893_v16 = vpop.f32.mrb[2].mxu0 }
 0x4b4   : > { %v1466_v17 = vpop.f32.mrb[3].mxu0 }
 0x517   : > { %v969_v24 = vpop.f32.mrb[8].mxu1 }
 0x518   : > { %1126 = vrot.lane.b32.xlu1 %v969_v24, %s1774_s11  ;;  %v1471_v25 = vpop.f32.mrb[9].mxu1  ;;  %s1272_s11 = sshll.u32 %s360_s24, 4  ;;  %s2114_s11 = int_to_ptr.vmem [resolvable:$true] %s1272_s11 }
 0x519   : > { %s1689_s16 = scalar_lea.vmem %s2114_s11, 128  ;;  %p1696_p9 = scmp.lt.s32.totalorder %s2114_s11, %s1694_s10 }
 0x51a   : > { %p1690_p0 = scmp.ne.s32.totalorder %s2114_s11, %s1689_s16  ;;  %p1697_p12 = scmp.lt.s32.totalorder %s1695_s18, %s1689_s16 }
 0x51c   : > { %v1045_v1 = vpop.f32.mrb[4].mxu0  ;;  %p1691_p3 = pnand %p1690_p0, %p2179_p1  ;;  %p1698_p2 = por %p1697_p12, %p1696_p9 }
 0x51d   : > { %1130 = vrot.lane.b32.xlu0 %v1045_v1, %s1775_s13  ;;  %v1476_v26 = vpop.f32.mrb[5].mxu0 }
 0x51e   : > { %p1692_p7 = pneg %p1691_p3 }
 0x520   : > { %v1121_v27 = vpop.f32.mrb[10].mxu1  ;;  %p1699_p13 = pnand %p1698_p2, %p1692_p7 }
 0x521   : > { %1134 = vrot.lane.b32.xlu1 %v1121_v27, %s1776_s26  ;;  %v1481_v28 = vpop.f32.mrb[11].mxu1 }
 0x58a   : > { %v1127_v29 = vpop.permute.xlu1 %1126 }
 0x58b   : > { %v1137_v0 = vsel %vm459_vm2, %v893_v16, %v1127_v29 }
 0x58f   : > { %v1131_v30 = vpop.permute.xlu0 %1130 }
 0x590   : > { %v1139_v31 = vsel %vm1138_vm3, %v1137_v0, %v1131_v30 }
 0x593   : > { %v1135_v32 = vpop.permute.xlu1 %1134 }
 0x594   : > { %v1141_v33 = vsel %vm1140_vm4, %v1139_v31, %v1135_v32 }
 0x595   : > { %1491 = vmatmul.mubr.msk.f32.vlgmr.msra.gmra.mrb[6].mxu0 %vm376_vm1, %v1141_v33 }
 0x668   : > { %v1222_v35 = vpop.f32.mrb[6].mxu0 }
 0x669   : > { %v1223_v36 = vadd.f32 %v1397_v34, %v1222_v35  ;;  %v1492_v37 = vpop.f32.mrb[7].mxu0 }
 0x66b   : > { %v1226_v38 = vadd.f32 %v1223_v36, %v2013_v8  ;;  %v1399_v8 = vld [vmem:[%s2163_s6] ss:$0 sm:$0xff] }
 0x66d   : > { %v1227_v39 = vsel %vm376_vm1, %v1226_v38, 0.0 }
 0x66e   : > { %1228 = vadd.xlane.f32.xlu0 %v1227_v39 }
 0x6fb   : > { %v1229_v40 = vpop.xlane.xlu0 %1228 }
 0x6fc   : > { %v1231_v41 = vmul.f32 0.03125, %v1229_v40 }
 0x6fe   : > { %v1232_v42 = vsub.f32 %v1226_v38, %v1231_v41 }
 0x700   : > { %v1233_v43 = vmul.f32 %v1232_v42, %v1232_v42 }
 0x702   : > { %v1234_v44 = vsel %vm376_vm1, %v1233_v43, 0.0 }
 0x703   : > { %1235 = vadd.xlane.f32.xlu1 %v1234_v44 }
 0x790   : > { %v1236_v45 = vpop.xlane.xlu1 %1235 }
 0x791   : > { %v1237_v46 = vmul.f32 0.03125, %v1236_v45 }
 0x793   : > { %v1238_v47 = vadd.f32 1e-12, %v1237_v46 }
 0x795   : > { %1601 = vrsqrt.f32 %v1238_v47 }
 0x79f   : > { %v1602_v48 = vpop.eup %1601 }
 0x7a0   : > { %v1240_v49 = vmul.f32 %v1602_v48, %v1232_v42 }
 0x7a2   : > { %v1248_v51 = vmul.f32 %v1399_v8, %v1240_v49 }
 0x7a4   : > { %v1256_v52 = vadd.f32 %v1400_v50, %v1248_v51 }
 0x7a6   : > { %1257 = vst.msk [vmem:[%s360_s24] sm:$0xff] %vm376_vm1, %v1256_v52 }
 0x7a7   : > { %1702 = shalt.err (!%p1699_p13)
}
 0x7a8   : > { %s1703_s21 = scalar_lea.hbm %s2112_s17, 128  ;;  %s1707_s15 = scalar_lea.hbm %s2165_s8, 256 }
 0x7a9   : > { %p1704_p6 = scmp.ne.s32.totalorder %s2112_s17, %s1703_s21  ;;  %p1708_p5 = scmp.lt.u32.totalorder %s2112_s17, %s2165_s8 }
 0x7aa   : > { %p1709_p8 = scmp.lt.u32.totalorder %s1707_s15, %s1703_s21  ;;  %p1711_p0 = scmp.lt.u32.totalorder %s1703_s21, %s2112_s17 }
 0x7ab   : > { %p1705_p10 = pnand %p1704_p6, %p2179_p1 }
 0x7ac   : > { %p1710_p11 = por %p1709_p8, %p1708_p5 }
 0x7ad   : > { %p1706_p4 = pneg %p1705_p10 }
 0x7ae   : > { %p1712_p3 = por %p1711_p0, %p1710_p11 }
 0x7b0   : > { %p1713_p7 = pnand %p1712_p3, %p1706_p4 }
 0x7b2   : > { %1716 = shalt.err (!%p1713_p7)
}
 0x7b3   : > { %1515 = dma.vmem_to_hbm [thread:$0]  (%p2179_p1), %s2114_s11, 128, %s2112_s17, %s1259_s19  }
 0x7b4 PF: > { %s1284_s26 = sand.u32 1, %s1747_s27   ;;  %p2180_p9 = scmp.ne.s32.totalorder %s2170_s12, 0 }
 0x7b5   : > { %p2181_p12 = scmp.ge.s32.totalorder %s1759_s30, 2  ;;  %s1285_s16 = scalar_lea.sflag [#allocation4], %s1284_s26 }
 0x7b7   : > { %p1529_p2 = pnand %p2181_p12, %p2180_p9 }
 0x7b9   : > { %1742 = dma.done.wait (!%p1529_p2), %s1285_s16, 128  }
 0x7ba   : > { %1744 = vsyncadd (!%p1529_p2), %s1285_s16, 4294967168  ;;  %p22_p13 = scmp.ge.s32.totalorder %s1933_s20, 4   ;;  %s2182_s27 = smov %s1751_s28 }
 0x7bb   : > { %s2183_s28 = smov %s1755_s29  ;;  %s2184_s29 = smov %s1949_s23 }
 0x7bc   : > { %s2185_s30 = smov %s1933_s20  ;;  %24 = sbr.rel (!%p22_p13) target bundleno = 6 (0x6), region = 108 }
 0x7c3   :  { %1290 = vsyncpa [#allocation3], 1 }
 0x7c4   :  { %1292 = vsyncpa [#allocation3 + $0x1], 1 }
 0x7c5   :  { %1293 = vsyncpa [#allocation6], 1 }
 0x7c6   :  { %1294 = vsyncpa [#allocation4], 1 }
 0x7c7   :  { %1296 = vsyncpa [#allocation4 + $0x1], 1 }

</bundles_post_ra>
